<compile_context>
chip_gen: v7x
topology: tpu7x:2x2x1
jax: 0.10.0
libtpu: 0.0.40
codegen_flags: <defaults>
</compile_context>

<pallas_src>
import functools

import jax
import jax.numpy as jnp
from jax.experimental import pallas as pl
from jax.experimental.pallas import tpu as pltpu

FEAT = 512          # per-encoder feature width (512 + 512 = 1024 -> embedding input)
EMB = 768
NCLS = 25


# --------------------------------------------------------------------------- #
# Kernel 1: HBM-bound streaming pooling over the volume.                       #
# --------------------------------------------------------------------------- #
def _pool_kernel(x_ref, sum3_ref, max2_ref, *, group):
    """Grid = (B, S, D tiles).  x_ref block: (1, C, tile_d, H*W) float32.

    sum3_ref / max2_ref blocks: (1, 1, C, H*W), resident across the D-tile axis (same
    block index for every d) -> they ARE the accumulators; Pallas writes each back to
    HBM once per (b, s).
    """
    d = pl.program_id(2)

    @pl.when(d == 0)
    def _init():
        sum3_ref[...] = jnp.zeros_like(sum3_ref)
        max2_ref[...] = jnp.zeros_like(max2_ref)

    x = x_ref[...][0]                                   # (C, TD, HW) f32
    c, td, hw = x.shape

    # ---- 3-D branch: running sum; sublane-only reduce (lane reduce deferred) ----
    sum3_ref[...] += jnp.sum(x, axis=1).reshape(1, 1, c, hw)

    # ---- 2-D branch: torch.max(x_3d, axis=-1) == max over each W-wide lane group ----
    # Single-direction max-doubling tree: at step s, lane i takes max with lane i+s
    # (pltpu.roll(shift=hw-s) brings lane i+s to lane i, same convention as jnp.roll).
    # After log2(W) steps lane i covers lanes [i, i+2^k), so each group-leader lane
    # (lane % W == 0) holds exactly its own group's max when W is a power of two --
    # no per-level mask needed; non-leader lanes may see cross-group values but are
    # discarded by the leader select below.
    x2 = x.reshape(c * td, hw)                          # free merge: td % 8 == 0
    m = x2
    s = 1
    if group & (group - 1):                             # non-power-of-two W: mask levels
        lane = jax.lax.broadcasted_iota(jnp.int32, (c * td, hw), 1)
        r = lane % group
        while s < group:                                # unrolled at trace time
            shifted = pltpu.roll(m, shift=hw - s, axis=1)
            m = jnp.where(r < group - s, jnp.maximum(m, shifted), m)
            s *= 2
    else:                                               # power-of-two W: unmasked tree
        while s < group:
            m = jnp.maximum(m, pltpu.roll(m, shift=hw - s, axis=1))
            s *= 2
        r = jax.lax.broadcasted_iota(jnp.int32, (c * td, hw), 1) % group

    leaders = jnp.where(r == 0, m, 0.0)                 # one max kept per (d, h) group
    max2_ref[...] += jnp.sum(leaders.reshape(c, td, hw), axis=1).reshape(1, 1, c, hw)


# --------------------------------------------------------------------------- #
# Kernel 2: head (deferred reductions + encoder heads + embedding + classifier)#
# --------------------------------------------------------------------------- #
def _head_kernel(p3_ref, p2_ref, w3_ref, b3_ref, w2_ref, b2_ref,
                 we3_ref, we2_ref, be_ref, wc_ref, bc_ref, out_ref,
                 *, inv_dhw, inv_dh):
    """Single grid step.  p3/p2 blocks: (B, S, C, H*W); out block: (B, 128)."""
    # Deferred reductions: sum the D-split axis (plain vreg adds), then the HW lanes.
    pooled3 = jnp.sum(jnp.sum(p3_ref[...], axis=1), axis=-1) * inv_dhw    # (B, C)
    pooled2 = jnp.sum(jnp.sum(p2_ref[...], axis=1), axis=-1) * inv_dh     # (B, C)

    f3 = jnp.maximum(
        jnp.dot(pooled3, w3_ref[...], preferred_element_type=jnp.float32) + b3_ref[...],
        0.0)                                                              # (B, 512)
    f2 = jnp.maximum(
        jnp.dot(pooled2, w2_ref[...], preferred_element_type=jnp.float32) + b2_ref[...],
        0.0)                                                              # (B, 512)

    # cat((f3, f2), dim=1) @ we  ==  f3 @ we[:512] + f2 @ we[512:]
    z = jnp.tanh(
        jnp.dot(f3, we3_ref[...], preferred_element_type=jnp.float32)
        + jnp.dot(f2, we2_ref[...], preferred_element_type=jnp.float32)
        + be_ref[...])                                                    # (B, 768)

    logits = jnp.dot(z, wc_ref[...], preferred_element_type=jnp.float32) + bc_ref[...]
    mx = jnp.max(logits, axis=-1, keepdims=True)
    lse = jnp.log(jnp.sum(jnp.exp(logits - mx), axis=-1, keepdims=True)) + mx
    out_ref[...] = logits - lse          # (B, 128) lane-dense; padded cols are junk


# --------------------------------------------------------------------------- #
# Wrapper helpers                                                              #
# --------------------------------------------------------------------------- #
def _vmem_budgets():
    """Generation-aware (double-buffered x-tile budget, scoped vmem limit) in bytes.

    The pool kernel keeps ~4-5 tile-sized temporaries live (roll tree + leader select)
    on top of the double-buffered input window, so the tile budget is ~1/5 of the limit.
    """
    try:
        cap = int(pltpu.get_tpu_info().vmem_capacity_bytes)
    except Exception:                    # unknown backend/attribute -> conservative
        cap = 64 << 20
    if cap >= 100 << 20:                 # v5e / v6e class: 128 MiB physical VMEM
        return 20 << 20, 96 << 20
    return 10 << 20, 44 << 20            # v7x class: 64 MiB physical VMEM


def _pick_tile_d(d_pad, c, hw, budget_bytes):
    """Largest multiple-of-8 divisor of d_pad whose double-buffered f32 x tile fits.

    Falls back to the *smallest* legal tile (8) -- never the whole D axis -- so an
    oversized D can never blow the scoped VMEM limit.
    """
    best = 8
    for t in range(8, d_pad + 1, 8):
        if d_pad % t == 0 and 2 * c * t * hw * 4 <= budget_bytes:
            best = t
    return best


def _pick_d_splits(batch, num_tiles):
    """Second 'parallel' grid axis so both v7x TensorCores stay busy when B == 1."""
    if batch >= 2 or num_tiles < 2 or num_tiles % 2:
        return 1
    return 2


def _head_forward(partial3, partial2, params, *, inv_dhw, inv_dh):
    B = partial3.shape[0]
    ncls = params["wc"].shape[1]
    npad = -(-ncls // 128) * 128         # lane-dense classifier / output width

    # Split the 1024->768 embedding weight at trace time; pad the classifier to 128
    # lanes (bias padded with -1e30 so LogSoftmax ignores the padded columns).
    we3 = params["we"][:FEAT, :]
    we2 = params["we"][FEAT:, :]
    wc_pad = jnp.pad(params["wc"], ((0, 0), (0, npad - ncls)))
    bc_pad = jnp.pad(params["bc"], ((0, 0), (0, npad - ncls)), constant_values=-1e30)

    def _full(arr):                      # whole array as one VMEM block
        n = arr.ndim
        return pl.BlockSpec(arr.shape, lambda i, _n=n: (0,) * _n)

    out = pl.pallas_call(
        functools.partial(_head_kernel, inv_dhw=inv_dhw, inv_dh=inv_dh),
        out_shape=jax.ShapeDtypeStruct((B, npad), jnp.float32),
        grid_spec=pltpu.PrefetchScalarGridSpec(
            num_scalar_prefetch=0,
            grid=(1,),
            in_specs=[_full(partial3), _full(partial2),
                      _full(params["w3"]), _full(params["b3"]),
                      _full(params["w2"]), _full(params["b2"]),
                      _full(we3), _full(we2), _full(params["be"]),
                      _full(wc_pad), _full(bc_pad)],
            out_specs=pl.BlockSpec((B, npad), lambda i: (0, 0)),
        ),
    )(partial3, partial2, params["w3"], params["b3"], params["w2"], params["b2"],
      we3, we2, params["be"], wc_pad, bc_pad)
    return out[:, :ncls]


def combined_model_forward(x_3d, params, *, tile_d=None):
    """x_3d: (B, C, D, H, W) float32.  Returns log-probabilities (B, 25)."""
    B, C, D, H, W = x_3d.shape
    HW = H * W

    # Zero-pad D up to a multiple of 8 (legal second-to-last block dim).  Padded planes
    # contribute exactly 0 to both running sums; normalization uses the true D.
    d_pad = -(-D // 8) * 8
    if d_pad != D:
        x_3d = jnp.pad(x_3d, ((0, 0), (0, 0), (0, d_pad - D), (0, 0), (0, 0)))
    x = x_3d.reshape(B, C, d_pad, HW)    # free reshape: lane-dense last dim (H*W)
    # TODO(synk): if the data contract allows, stream the volume as bfloat16 here
    #             (~2x on this HBM-bound kernel); kept float32 to match the module.

    budget, vmem_limit = _vmem_budgets()
    if tile_d is None:
        tile_d = _pick_tile_d(d_pad, C, HW, budget)
    assert d_pad % tile_d == 0 and tile_d % 8 == 0, (D, d_pad, tile_d)

    nd = d_pad // tile_d
    S = _pick_d_splits(B, nd)
    nd_inner = nd // S

    partial3, partial2 = pl.pallas_call(
        functools.partial(_pool_kernel, group=W),
        out_shape=(jax.ShapeDtypeStruct((B, S, C, HW), jnp.float32),
                   jax.ShapeDtypeStruct((B, S, C, HW), jnp.float32)),
        grid_spec=pltpu.PrefetchScalarGridSpec(
            num_scalar_prefetch=0,
            grid=(B, S, nd_inner),
            in_specs=[pl.BlockSpec(
                (1, C, tile_d, HW),
                lambda b, s, d, _n=nd_inner: (b, 0, s * _n + d, 0))],
            out_specs=[pl.BlockSpec((1, 1, C, HW), lambda b, s, d: (b, s, 0, 0)),
                       pl.BlockSpec((1, 1, C, HW), lambda b, s, d: (b, s, 0, 0))],
        ),
        compiler_params=pltpu.CompilerParams(
            dimension_semantics=("parallel", "parallel", "arbitrary"),
            vmem_limit_bytes=vmem_limit,
        ),
    )(x)

    return _head_forward(partial3, partial2, params,
                         inv_dhw=1.0 / float(D * H * W),
                         inv_dh=1.0 / float(D * H))


# --------------------------------------------------------------------------- #
# Parameters & pure-JAX reference                                              #
# --------------------------------------------------------------------------- #
def init_params(key, C):
    ks = jax.random.split(key, 8)
    scale = 0.05
    return {
        "w3": scale * jax.random.normal(ks[0], (C, FEAT), jnp.float32),
        "b3": scale * jax.random.normal(ks[1], (1, FEAT), jnp.float32),
        "w2": scale * jax.random.normal(ks[2], (C, FEAT), jnp.float32),
        "b2": scale * jax.random.normal(ks[3], (1, FEAT), jnp.float32),
        "we": scale * jax.random.normal(ks[4], (2 * FEAT, EMB), jnp.float32),
        "be": scale * jax.random.normal(ks[5], (1, EMB), jnp.float32),
        "wc": scale * jax.random.normal(ks[6], (EMB, NCLS), jnp.float32),
        "bc": scale * jax.random.normal(ks[7], (1, NCLS), jnp.float32),
    }


def reference_forward(x_3d, params):
    """Pure-JAX reference of the stand-in CombinedModel forward."""
    hi = jax.lax.Precision.HIGHEST
    x2d = jnp.max(x_3d, axis=-1)                         # torch.max(x_3d, axis=-1).values
    pooled_3d = jnp.mean(x_3d, axis=(2, 3, 4))           # stand-in enc_3d pooling
    pooled_2d = jnp.mean(x2d, axis=(2, 3))               # stand-in enc_2d pooling
    f3 = jnp.maximum(jnp.dot(pooled_3d, params["w3"], precision=hi) + params["b3"], 0.0)
    f2 = jnp.maximum(jnp.dot(pooled_2d, params["w2"], precision=hi) + params["b2"], 0.0)
    comb = jnp.concatenate([f3, f2], axis=1)
    z = jnp.tanh(jnp.dot(comb, params["we"], precision=hi) + params["be"])
    logits = jnp.dot(z, params["wc"], precision=hi) + params["bc"]
    return jax.nn.log_softmax(logits, axis=-1)


if __name__ == "__main__":
    key = jax.random.PRNGKey(0)
    k_x, k_p = jax.random.split(key)

    B, C, D, H, W = 2, 4, 16, 16, 16
    x_3d = jax.random.normal(k_x, (B, C, D, H, W), jnp.float32)
    params = init_params(k_p, C)
    ref = reference_forward(x_3d, params)

    # (1) tile_d=8 forces a 2-step streamed reduction over D (init/accumulate/writeback).
    out = jax.block_until_ready(combined_model_forward(x_3d, params, tile_d=8))
    assert out.shape == (B, NCLS), out.shape
    assert bool(jnp.allclose(jnp.sum(jnp.exp(out), axis=-1), 1.0, atol=1e-4))
    assert bool(jnp.allclose(out, ref, atol=2e-3, rtol=2e-3)), \
        float(jnp.max(jnp.abs(out - ref)))

    # (2) B == 1 exercises the D-split second "parallel" axis (v7x megacore guard).
    out1 = jax.block_until_ready(combined_model_forward(x_3d[:1], params, tile_d=8))
    assert bool(jnp.allclose(out1, ref[:1], atol=2e-3, rtol=2e-3))

    # (3) D not a multiple of 8 exercises zero-padding + automatic tile picking.
    x_odd = x_3d[:, :, :12]
    out_odd = jax.block_until_ready(combined_model_forward(x_odd, params))
    ref_odd = reference_forward(x_odd, params)
    assert bool(jnp.allclose(out_odd, ref_odd, atol=2e-3, rtol=2e-3))

    print("KERNEL_OK")
</pallas_src>

<mosaic_0001>
module attributes {stable_mosaic.version = 11 : i64} {
  func.func @_pool_kernel(%arg0: i32, %arg1: i32, %arg2: i32, %arg3: memref<1x4x8x256xf32, #tpu.memory_space<vmem>>, %arg4: memref<1x1x4x256xf32, #tpu.memory_space<vmem>>, %arg5: memref<1x1x4x256xf32, #tpu.memory_space<vmem>>) attributes {dimension_semantics = [#tpu.dimension_semantics<parallel>, #tpu.dimension_semantics<parallel>, #tpu.dimension_semantics<arbitrary>], iteration_bounds = array<i64: 2, 1, 2>, scalar_prefetch = 0 : i64, scratch_operands = 0 : i64, tpu.core_type = #tpu.core_type<tc>, window_params = [{transform_indices = @transform_0, window_bounds = array<i64: 1, 4, 8, 256>}, {transform_indices = @transform_1, window_bounds = array<i64: 1, 1, 4, 256>}, {transform_indices = @transform_2, window_bounds = array<i64: 1, 1, 4, 256>}]} {
    %c0_i32 = arith.constant 0 : i32
    %0 = arith.cmpi eq, %arg2, %c0_i32 : i32
    %1 = arith.extui %0 : i1 to i32
    %c0_i32_0 = arith.constant 0 : i32
    %2 = arith.cmpi ne, %1, %c0_i32_0 : i32
    scf.if %2 {
      %cst_27 = arith.constant 0.000000e+00 : f32
      %46 = vector.broadcast %cst_27 : f32 to vector<1x1x4x256xf32>
      %c0_28 = arith.constant 0 : index
      %c0_29 = arith.constant 0 : index
      %c0_30 = arith.constant 0 : index
      %c0_31 = arith.constant 0 : index
      %47 = vector.load %arg4[%c0_28, %c0_29, %c0_30, %c0_31] : memref<1x1x4x256xf32, #tpu.memory_space<vmem>>, vector<1x1x4x256xf32>
      tpu.vector_store %arg4[%c0_28, %c0_29, %c0_30, %c0_31], %46 {strides = array<i32>} : memref<1x1x4x256xf32, #tpu.memory_space<vmem>>, vector<1x1x4x256xf32>,
      %cst_32 = arith.constant 0.000000e+00 : f32
      %48 = vector.broadcast %cst_32 : f32 to vector<1x1x4x256xf32>
      %c0_33 = arith.constant 0 : index
      %c0_34 = arith.constant 0 : index
      %c0_35 = arith.constant 0 : index
      %c0_36 = arith.constant 0 : index
      %49 = vector.load %arg5[%c0_33, %c0_34, %c0_35, %c0_36] : memref<1x1x4x256xf32, #tpu.memory_space<vmem>>, vector<1x1x4x256xf32>
      tpu.vector_store %arg5[%c0_33, %c0_34, %c0_35, %c0_36], %48 {strides = array<i32>} : memref<1x1x4x256xf32, #tpu.memory_space<vmem>>, vector<1x1x4x256xf32>,
    } else {
    }
    %c0 = arith.constant 0 : index
    %c0_1 = arith.constant 0 : index
    %c0_2 = arith.constant 0 : index
    %c0_3 = arith.constant 0 : index
    %3 = vector.load %arg3[%c0, %c0_1, %c0_2, %c0_3] : memref<1x4x8x256xf32, #tpu.memory_space<vmem>>, vector<1x4x8x256xf32>
    %4 = vector.shape_cast %3 : vector<1x4x8x256xf32> to vector<4x8x256xf32>
    %c0_4 = arith.constant 0 : index
    %c0_5 = arith.constant 0 : index
    %c0_6 = arith.constant 0 : index
    %c0_7 = arith.constant 0 : index
    %5 = vector.load %arg4[%c0_4, %c0_5, %c0_6, %c0_7] : memref<1x1x4x256xf32, #tpu.memory_space<vmem>>, vector<1x1x4x256xf32>
    %cst = arith.constant dense<0.000000e+00> : vector<4x256xf32>
    %6 = vector.multi_reduction <add>, %4, %cst [1] : vector<4x8x256xf32> to vector<4x256xf32>
    %7 = vector.shape_cast %6 : vector<4x256xf32> to vector<1x1x4x256xf32>
    %8 = arith.addf %5, %7 : vector<1x1x4x256xf32>
    %c0_8 = arith.constant 0 : index
    %c0_9 = arith.constant 0 : index
    %c0_10 = arith.constant 0 : index
    %c0_11 = arith.constant 0 : index
    %9 = vector.load %arg4[%c0_8, %c0_9, %c0_10, %c0_11] : memref<1x1x4x256xf32, #tpu.memory_space<vmem>>, vector<1x1x4x256xf32>
    tpu.vector_store %arg4[%c0_8, %c0_9, %c0_10, %c0_11], %8 {strides = array<i32>} : memref<1x1x4x256xf32, #tpu.memory_space<vmem>>, vector<1x1x4x256xf32>,
    %10 = vector.shape_cast %4 : vector<4x8x256xf32> to vector<32x256xf32>
    %c255_i32 = arith.constant 255 : i32
    %11 = tpu.dynamic_rotate %10 by %c255_i32 dim 1 : vector<32x256xf32>, i32 -> vector<32x256xf32>
    %12 = arith.maximumf %10, %11 : vector<32x256xf32>
    %c254_i32 = arith.constant 254 : i32
    %13 = tpu.dynamic_rotate %12 by %c254_i32 dim 1 : vector<32x256xf32>, i32 -> vector<32x256xf32>
    %14 = arith.maximumf %12, %13 : vector<32x256xf32>
    %c252_i32 = arith.constant 252 : i32
    %15 = tpu.dynamic_rotate %14 by %c252_i32 dim 1 : vector<32x256xf32>, i32 -> vector<32x256xf32>
    %16 = arith.maximumf %14, %15 : vector<32x256xf32>
    %c248_i32 = arith.constant 248 : i32
    %17 = tpu.dynamic_rotate %16 by %c248_i32 dim 1 : vector<32x256xf32>, i32 -> vector<32x256xf32>
    %18 = arith.maximumf %16, %17 : vector<32x256xf32>
    %19 = tpu.iota {dimensions = array<i32: 1>} : vector<32x256xi32>
    %c16_i32 = arith.constant 16 : i32
    %c0_i32_12 = arith.constant 0 : i32
    %20 = arith.cmpi eq, %c16_i32, %c0_i32_12 : i32
    %c1_i32 = arith.constant 1 : i32
    %21 = arith.select %20, %c1_i32, %c16_i32 : i32
    %22 = vector.broadcast %21 : i32 to vector<32x256xi32>
    %23 = arith.remsi %19, %22 : vector<32x256xi32>
    %c0_i32_13 = arith.constant 0 : i32
    %24 = vector.broadcast %c0_i32_13 : i32 to vector<32x256xi32>
    %25 = arith.cmpi ne, %23, %24 : vector<32x256xi32>
    %c0_i32_14 = arith.constant 0 : i32
    %26 = vector.broadcast %c0_i32_14 : i32 to vector<32x256xi32>
    %27 = arith.cmpi slt, %23, %26 : vector<32x256xi32>
    %c0_i32_15 = arith.constant 0 : i32
    %28 = arith.cmpi slt, %21, %c0_i32_15 : i32
    %29 = vector.broadcast %28 : i1 to vector<32x256xi1>
    %30 = vector.broadcast %29 : vector<32x256xi1> to vector<32x256xi1>
    %31 = arith.xori %27, %30 : vector<32x256xi1>
    %32 = arith.andi %31, %25 : vector<32x256xi1>
    %33 = vector.broadcast %21 : i32 to vector<32x256xi32>
    %34 = arith.addi %23, %33 : vector<32x256xi32>
    %35 = arith.select %32, %34, %23 : vector<32x256xi1>, vector<32x256xi32>
    %c0_i32_16 = arith.constant 0 : i32
    %36 = vector.broadcast %c0_i32_16 : i32 to vector<32x256xi32>
    %37 = arith.cmpi eq, %35, %36 : vector<32x256xi32>
    %cst_17 = arith.constant 0.000000e+00 : f32
    %38 = vector.broadcast %cst_17 : f32 to vector<32x256xf32>
    %39 = arith.select %37, %18, %38 : vector<32x256xi1>, vector<32x256xf32>
    %c0_18 = arith.constant 0 : index
    %c0_19 = arith.constant 0 : index
    %c0_20 = arith.constant 0 : index
    %c0_21 = arith.constant 0 : index
    %40 = vector.load %arg5[%c0_18, %c0_19, %c0_20, %c0_21] : memref<1x1x4x256xf32, #tpu.memory_space<vmem>>, vector<1x1x4x256xf32>
    %41 = vector.shape_cast %39 : vector<32x256xf32> to vector<4x8x256xf32>
    %cst_22 = arith.constant dense<0.000000e+00> : vector<4x256xf32>
    %42 = vector.multi_reduction <add>, %41, %cst_22 [1] : vector<4x8x256xf32> to vector<4x256xf32>
    %43 = vector.shape_cast %42 : vector<4x256xf32> to vector<1x1x4x256xf32>
    %44 = arith.addf %40, %43 : vector<1x1x4x256xf32>
    %c0_23 = arith.constant 0 : index
    %c0_24 = arith.constant 0 : index
    %c0_25 = arith.constant 0 : index
    %c0_26 = arith.constant 0 : index
    %45 = vector.load %arg5[%c0_23, %c0_24, %c0_25, %c0_26] : memref<1x1x4x256xf32, #tpu.memory_space<vmem>>, vector<1x1x4x256xf32>
    tpu.vector_store %arg5[%c0_23, %c0_24, %c0_25, %c0_26], %44 {strides = array<i32>} : memref<1x1x4x256xf32, #tpu.memory_space<vmem>>, vector<1x1x4x256xf32>,
    return
  }
  func.func @transform_0(%arg0: i32, %arg1: i32, %arg2: i32) -> (i32, i32, i32, i32) {
    %c2_i32 = arith.constant 2 : i32
    %0 = arith.muli %arg1, %c2_i32 : i32
    %1 = arith.addi %0, %arg2 : i32
    %c0_i32 = arith.constant 0 : i32
    %c0_i32_0 = arith.constant 0 : i32
    %c0_i32_1 = arith.constant 0 : i32
    return %arg0, %c0_i32, %1, %c0_i32_0 : i32, i32, i32, i32
  }
  func.func @transform_1(%arg0: i32, %arg1: i32, %arg2: i32) -> (i32, i32, i32, i32) {
    %c0_i32 = arith.constant 0 : i32
    %c0_i32_0 = arith.constant 0 : i32
    %c0_i32_1 = arith.constant 0 : i32
    return %arg0, %arg1, %c0_i32, %c0_i32_0 : i32, i32, i32, i32
  }
  func.func @transform_2(%arg0: i32, %arg1: i32, %arg2: i32) -> (i32, i32, i32, i32) {
    %c0_i32 = arith.constant 0 : i32
    %c0_i32_0 = arith.constant 0 : i32
    %c0_i32_1 = arith.constant 0 : i32
    return %arg0, %arg1, %c0_i32, %c0_i32_0 : i32, i32, i32, i32
  }
}

</mosaic_0001>

<bundles_post_ra>
// kernel: tpu_custom_call.1
= control target key start
LH: loop header
LB: loop body
LE: loop exit
PB: predicated region body
PF: predicated region fallthrough
CT: control target
= control target key end

     0   :  { %8 = vsyncpa [#allocation3], 0  ;;  %s1547_s0 = inlined_call_operand.hbm [shape: f32[2,4,16,256], index: 0, kind: input, shape index: {}]   ;;  %s1548_s1 = inlined_call_operand.hbm [shape: f32[2,1,4,256], index: 1, kind: output, shape index: {0}]   ;;  %s1549_s2 = inlined_call_operand.hbm [shape: f32[2,1,4,256], index: 2, kind: output, shape index: {1}]  }
   0x1   :  { %10 = vsyncpa [#allocation3 + $0x1], 0 }
   0x2   :  { %11 = vsyncpa [#allocation4], 0 }
   0x3   :  { %13 = vsyncpa [#allocation4 + $0x1], 0 }
   0x4   :  { %14 = vsyncpa [#allocation7], 0 }
   0x5   :  { %16 = vsyncpa [#allocation7 + $0x1], 0  ;;  %s1058_s9 = smov 0   ;;  %s1060_s10 = smov 0  }
   0x6   :  { %s1062_s11 = smov 0   ;;  %s1064_s12 = smov 0  }
   0x7   :  { %s1066_s13 = smov 0   ;;  %s1068_s14 = smov 0  }
   0x8   :  { %s1070_s15 = smov 0   ;;  %s1072_s16 = smov 0  }
   0x9   :  { %s1074_s17 = smov 0   ;;  %s1076_s18 = smov 0  }
   0xa   :  { %s1078_s19 = smov 0  }
   0xb LB: > { %s708_s20 = sadd.s32 4294967295, %s1030_s19   ;;  %s709_s21 = sadd.s32 4294967294, %s1030_s19   ;;  %s1030_s19 = sphi %s1078_s19, %s22_s19   ;;  %s1026_s18 = sphi %s1076_s18, %s1578_s18   ;;  %s1022_s17 = sphi %s1074_s17, %s1577_s17   ;;  %s1018_s16 = sphi %s1072_s16, %s1576_s16   ;;  %s1014_s15 = sphi %s1070_s15, %s1575_s15   ;;  %s1010_s14 = sphi %s1068_s14, %s1574_s14   ;;  %s1006_s13 = sphi %s1066_s13, %s1573_s13   ;;  %s1002_s12 = sphi %s1064_s12, %s1572_s12   ;;  %s998_s11 = sphi %s1062_s11, %s1571_s11   ;;  %s994_s10 = sphi %s1060_s10, %s1570_s10   ;;  %s990_s9 = sphi %s1058_s9, %s1569_s9  }
   0xc   : > { %s34_s22 = sadd.s32 1, %s1022_s17  ;;  %s41_s23 = sadd.s32 1, %s1026_s18 }
   0xd   : > { %p35_p0 = scmp.ge.s32.totalorder %s34_s22, 2  ;;  %s54_s24 = sadd.s32 1, %s1010_s14 }
   0xe   : > { %p61_p1 = scmp.ne.s32.totalorder %s1010_s14, %s1006_s13  ;;  %p62_p2 = scmp.eq.s32.totalorder %s1030_s19, 0 }
   0xf   : > { %s1580_s22 = smov (%p35_p0, %s34_s22), 0  ;;  %s1582_s23 = smov (!%p35_p0, %s41_s23), %s1026_s18 }
  0x10   : > { %1553 = sst [smem:[#allocation11_spill]] %s1580_s22  ;;  %s50_s25 = ssub.s32 %s1022_s17, %s1580_s22 }
  0x11   : > { %p1124_p3 = por %p62_p2, %p61_p1  ;;  %p43_p4 = scmp.ge.s32.totalorder %s1582_s23, 2 }
  0x12   : > { %p67_p5 = scmp.ne.s32.totalorder %s1006_s13, %s1002_s12  ;;  %p68_p6 = scmp.eq.s32.totalorder %s708_s20, 0 }
  0x13   : > { %s82_s27 = sadd.s32 1, %s998_s11  ;;  %s1584_s23 = smov (%p43_p4, %s1582_s23), 0 }
  0x14   : > { %1555 = sst [smem:[#allocation12_spill]] %s1584_s23  ;;  %p1132_p7 = por %p68_p6, %p67_p5 }
  0x15   : > { %p92_p8 = scmp.ne.s32.totalorder %s998_s11, %s994_s10  ;;  %s49_s29 = ssub.s32 %s1026_s18, %s1584_s23 }
  0x16   : > { %p93_p9 = scmp.eq.s32.totalorder %s708_s20, 3  ;;  %s51_s30 = sor.u32 %s50_s25, %s49_s29 }
  0x17   : > { %p80_p10 = scmp.eq.s32.totalorder %s49_s29, 0  ;;  %p52_p11 = scmp.eq.s32.totalorder %s51_s30, 0 }
  0x18   : > { %p1140_p12 = por %p93_p9, %p92_p8  ;;  %p98_p13 = scmp.ne.s32.totalorder %s994_s10, %s990_s9 }
  0x19   : > { %s1145_s4 = scalar_select %p80_p10, %s998_s11, %s82_s27  }
  0x1a   : > { %s1557_s3 = scalar_select %p1140_p12, 1, 0 }
  0x1b   : > { %s1148_s5 = scalar_select %p52_p11, %s1010_s14, %s54_s24  }
  0x1c   : > { %p99_p0 = scmp.eq.s32.totalorder %s709_s21, 3  ;;  %p748_p1 = scmp.lt.s32.totalorder %s1030_s19, 4 }
  0x1d   : > { %s147_s7 = sand.u32 1, %s1010_s14   ;;  %s713_s12 = sshll.u32 %s1022_s17, 1 }
  0x1e   : > { %p1153_p2 = por %p99_p0, %p98_p13  ;;  %s712_s8 = sshll.u32 %s147_s7, 6 }
  0x1f   : > { %s714_s20 = sshll.u32 %s1026_s18, 4  ;;  %s151_s25 = scalar_lea.vmem [#allocation2], %s712_s8 }
  0x20   : > { %s1558_s6 = scalar_select %p1153_p2, 1, 0 }
  0x21   : > { %s162_s29 = sshll.u32 %s151_s25, 4  ;;  %s159_s30 = sadd.s32 %s714_s20, %s713_s12  ;;  %s1160_s29 = int_to_ptr.vmem [resolvable:$true] %s162_s29 }
  0x22   : > { %s715_s27 = sshll.u32 %s159_s30, 7  ;;  %p1164_p4 = pnand %p748_p1, %p1124_p3 }
  0x23   : > { %s1171_s22 = scalar_lea.hbm %s1547_s0, %s715_s27  ;;  %s1174_s8 = scalar_lea.sflag [#allocation3], %s147_s7 }
  0x24   : > { %s846_s12 = scalar_lea.hbm %s1171_s22, 1024  ;;  %p848_p3 = pneg %p1164_p4 }
  0x25   : > { %p847_p6 = scmp.ne.s32.totalorder %s1171_s22, %s846_s12  ;;  %s851_s20 = scalar_lea.hbm %s1547_s0, 4096 }
  0x26   : > { %p852_p10 = scmp.lt.u32.totalorder %s1171_s22, %s1547_s0  ;;  %p853_p11 = scmp.lt.u32.totalorder %s851_s20, %s846_s12 }
  0x27   : > { %p849_p8 = pnand %p848_p3, %p847_p6  ;;  %p855_p0 = scmp.lt.u32.totalorder %s846_s12, %s1171_s22 }
  0x28   : > { %p854_p13 = por %p853_p11, %p852_p10 }
  0x29   : > { %p850_p9 = pneg %p849_p8 }
  0x2a   : > { %p856_p1 = por %p855_p0, %p854_p13 }
  0x2c   : > { %p857_p5 = pnand %p856_p1, %p850_p9 }
  0x2e   : > { %860 = shalt.err (!%p857_p5)
}
  0x2f   : > { %s861_s7 = scalar_lea.vmem %s1160_s29, 1024  ;;  %s1032_s27 = smov [#allocation2]  }
  0x30   : > { %p862_p6 = scmp.ne.s32.totalorder %s1160_s29, %s861_s7  ;;  %s866_s21 = sshll.u32 %s1032_s27, 4  ;;  %s867_s21 = int_to_ptr.vmem [resolvable:$false] %s866_s21 }
  0x31   : > { %s868_s23 = scalar_lea.vmem %s867_s21, 2048  ;;  %p869_p12 = scmp.lt.s32.totalorder %s1160_s29, %s867_s21 }
  0x32   : > { %p864_p8 = pnand %p862_p6, %p848_p3  ;;  %p870_p10 = scmp.lt.s32.totalorder %s868_s23, %s861_s7 }
  0x34   : > { %p865_p2 = pneg %p864_p8  ;;  %p871_p11 = por %p870_p10, %p869_p12 }
  0x36   : > { %p872_p13 = pnand %p871_p11, %p865_p2 }
  0x38   : > { %875 = shalt.err (!%p872_p13)
}
  0x39   : > { %s1033_s12 = smov 512   ;;  %s1034_s26 = smov 256  }
  0x3a   : > { %s1035_s20 = smov 16   ;;  %p170_p5 = scmp.lt.s32.totalorder %s1030_s19, 5 }
  0x3b   : > { %740 = dma.hbm_to_vmem [thread:$0]  (!%p1164_p4), %s1171_s22, 1024, %s1160_s29, %s1174_s8, %s1033_s12, %s1034_s26, %s1035_s20  }
  0x3c   : > { %p1560_p3 = scmp.ge.s32.totalorder %s1030_s19, 1 }
  0x3e   : > { %p171_p9 = pnand %p1560_p3, %p170_p5 }
  0x3f   : > { %s176_s25 = sand.u32 (!%p171_p9), 1, %s1006_s13  }
  0x40   : > { %174 = sbr.rel (%p171_p9) target bundleno = 616 (0x268), region = 24  ;;  %s717_s30 = sshll.u32 (!%p171_p9), %s176_s25, 6 }
  0x41   : > { %s177_s7 = scalar_lea.sflag (!%p171_p9), [#allocation3], %s176_s25  ;;  %s180_s27 = scalar_lea.vmem (!%p171_p9), [#allocation2], %s717_s30 }
  0x47   : > { %977 = dma.done.wait (%p1132_p7), %s177_s7, 1024  }
  0x48   : > { %979 = vsyncadd (%p1132_p7), %s177_s7, 4294966272  ;;  %s1211_s21 = sand.u32 1, %s994_s10   ;;  %p720_p12 = scmp.ne.s32.totalorder %s1014_s15, 0 }
  0x49   : > { %s718_s22 = sshll.u32 %s1211_s21, 3  ;;  %v1036_v0 = vmov (!%p720_p12), 0.0  }
  0x4a   : > { %s1214_s29 = scalar_lea.vmem [#allocation5], %s718_s22  ;;  %s1216_s24 = scalar_lea.vmem [#allocation6], %s718_s22 }
  0x4b   : > { %211 = sbr.rel (%p720_p12) target bundleno = 82 (0x52), region = 32  ;;  %212 = vst [vmem:[%s1214_s29] sm:$0xff] (!%p720_p12), %v1036_v0  ;;  %213 = vst [vmem:[%s1216_s24] sm:$0xff] (!%p720_p12), %v1036_v0 }
  0x52 PF: > { %v1221_v1 = vld [vmem:[%s180_s27 + $0x10] sm:$0xff]  ;;  %v1223_v2 = vld [vmem:[%s180_s27] sm:$0xff]  ;;  %s1037_s28 = smov 127   ;;  %v1227_v3 = vld [vmem:[%s180_s27 + $0x18] sm:$0xff]  ;;  %v317_v9 = vlaneseq  ;;  %s1038_s15 = smov 126   ;;  %vm284_vm3 = vcmask 1041409  }
  0x53   : > { %303 = vrot.lane.b32.xlu0 %v1221_v1, %s1037_s28  ;;  %301 = vrot.lane.b32.xlu1 %v1223_v2, %s1037_s28  ;;  %v1229_v4 = vld [vmem:[%s180_s27 + $0x20] sm:$0xff]  ;;  %v1233_v5 = vld [vmem:[%s180_s27 + $0x8] sm:$0xff]  ;;  %s1039_s8 = smov 124   ;;  %v235_v59 = vrot.slane %v1221_v1, 4  ;;  %v241_v60 = vrot.slane %v1227_v3, 4  ;;  %v223_v61 = vrot.slane %v1223_v2, 4 }
  0x54   : > { %v1235_v6 = vld [vmem:[%s180_s27 + $0x28] sm:$0xff]  ;;  %v1239_v7 = vld [vmem:[%s180_s27 + $0x30] sm:$0xff]  ;;  %v1241_v8 = vld [vmem:[%s180_s27 + $0x38] sm:$0xff]  ;;  %v1245_v10 = vand.u32 127, %v317_v9  ;;  %v247_v62 = vrot.slane %v1229_v4, 4  ;;  %v229_v63 = vrot.slane %v1233_v5, 4 }
  0x55   : > { %v253_v0 = vrot.slane %v1235_v6, 4  ;;  %v236_v9 = vadd.f32 %v235_v59, %v1221_v1  ;;  %s1040_s23 = smov 120   ;;  %vm286_vm4 = vcmask 1045509   ;;  %vm289_vm5 = vcmask 1042434   ;;  %s729_s12 = sshll.u32 %s1018_s16, 7 }
  0x56   : > { %vm319_vm0 = vcmp.lt.s32.totalorder %v1245_v10, 127  ;;  %vm352_vm1 = vcmp.lt.s32.totalorder %v1245_v10, 126  ;;  %vm385_vm2 = vcmp.lt.s32.totalorder %v1245_v10, 124  ;;  %vm294_vm6 = vcmask 1043459   ;;  %s565_s26 = sshll.u32 %s1214_s29, 4  ;;  %s1392_s30 = scalar_lea.hbm %s1548_s1, %s729_s12  ;;  %s1394_s26 = int_to_ptr.vmem [resolvable:$true] %s565_s26 }
  0x57   : > { %311 = vrot.lane.b32.xlu0 %v1227_v3, %s1037_s28  ;;  %305 = vrot.lane.b32.xlu1 %v1229_v4, %s1037_s28  ;;  %vm291_vm7 = vcmask 1046534   ;;  %vm296_vm8 = vcmask 1047559   ;;  %s544_s7 = scalar_lea.sflag [#allocation4], %s1211_s21  ;;  %s876_s27 = scalar_lea.vmem %s1394_s26, 128 }
  0x58   : > { %p877_p7 = scmp.ne.s32.totalorder %s1394_s26, %s876_s27  ;;  %p1561_p2 = scmp.ne.s32.totalorder %s1557_s3, 0 }
  0x59   : > { %s1041_s22 = smov [#allocation5]  }
  0x5a   : > { %p878_p4 = pnand %p877_p7, %p1561_p2 }
  0x5b   : > { %309 = vrot.lane.b32.xlu0 %v1233_v5, %s1037_s28  ;;  %313 = vrot.lane.b32.xlu1 %v1235_v6, %s1037_s28 }
  0x5c   : > { %p879_p0 = pneg %p878_p4 }
  0x5f   : > { %307 = vrot.lane.b32.xlu0 %v1239_v7, %s1037_s28  ;;  %315 = vrot.lane.b32.xlu1 %v1241_v8, %s1037_s28  ;;  %s880_s28 = sshll.u32 %s1041_s22, 4  ;;  %s881_s28 = int_to_ptr.vmem [resolvable:$false] %s880_s28 }
  0x60   : > { %p883_p1 = scmp.lt.s32.totalorder %s1394_s26, %s881_s28 }
  0xc5   : > { %v304_v11 = vpop.permute.xlu0 %303  ;;  %v302_v12 = vpop.permute.xlu1 %301 }
  0xc9   : > { %v312_v13 = vpop.permute.xlu0 %311  ;;  %v306_v14 = vpop.permute.xlu1 %305 }
  0xca   : > { %v321_v15 = vsel %vm319_vm0, %v304_v11, %v312_v13  ;;  %v325_v16 = vsel %vm319_vm0, %v312_v13, %v304_v11  ;;  %v242_v11 = vadd.f32 %v241_v60, %v1227_v3  ;;  %v248_v13 = vadd.f32 %v247_v62, %v1229_v4 }
  0xcb   : > { %v330_v17 = vmax.f32 %v1221_v1, %v321_v15  ;;  %v331_v18 = vmax.f32 %v1227_v3, %v325_v16  ;;  %v230_v16 = vadd.f32 %v229_v63, %v1233_v5  ;;  %v259_v1 = vrot.slane %v1239_v7, 4 }
  0xcc   : > { %v265_v3 = vrot.slane %v1241_v8, 4 }
  0xcd   : > { %338 = vrot.lane.b32.xlu0 %v330_v17, %s1038_s15  ;;  %v310_v19 = vpop.permute.xlu0 %309  ;;  %346 = vrot.lane.b32.xlu1 %v331_v18, %s1038_s15  ;;  %v314_v20 = vpop.permute.xlu1 %313 }
  0xce   : > { %v320_v21 = vsel %vm319_vm0, %v302_v12, %v310_v19  ;;  %v322_v22 = vsel %vm319_vm0, %v306_v14, %v314_v20  ;;  %v324_v25 = vsel %vm319_vm0, %v310_v19, %v302_v12  ;;  %v326_v26 = vsel %vm319_vm0, %v314_v20, %v306_v14 }
  0xcf   : > { %v328_v23 = vmax.f32 %v1223_v2, %v320_v21  ;;  %v332_v24 = vmax.f32 %v1229_v4, %v322_v22  ;;  %v329_v31 = vmax.f32 %v1233_v5, %v324_v25  ;;  %v333_v32 = vmax.f32 %v1235_v6, %v326_v26 }
  0xd0   : > { %v224_v12 = vadd.f32 %v223_v61, %v1223_v2  ;;  %v237_v4 = vrot.slane %v236_v9, 2  ;;  %v243_v21 = vrot.slane %v242_v11, 2  ;;  %v249_v5 = vrot.slane %v248_v13, 2 }
  0xd1   : > { %336 = vrot.lane.b32.xlu0 %v328_v23, %s1038_s15  ;;  %340 = vrot.lane.b32.xlu1 %v332_v24, %s1038_s15  ;;  %v308_v27 = vpop.permute.xlu0 %307  ;;  %v316_v28 = vpop.permute.xlu1 %315  ;;  %v266_v25 = vadd.f32 %v265_v3, %v1241_v8 }
  0xd2   : > { %v323_v29 = vsel %vm319_vm0, %v308_v27, %v316_v28  ;;  %v327_v30 = vsel %vm319_vm0, %v316_v28, %v308_v27  ;;  %v225_v22 = vrot.slane %v224_v12, 2  ;;  %v238_v26 = vadd.f32 %v237_v4, %v236_v9 }
  0xd3   : > { %v334_v33 = vmax.f32 %v1239_v7, %v323_v29  ;;  %v335_v34 = vmax.f32 %v1241_v8, %v327_v30  ;;  %v244_v27 = vadd.f32 %v243_v21, %v242_v11  ;;  %v250_v29 = vadd.f32 %v249_v5, %v248_v13  ;;  %v222_v21 = vld [vmem:[%s1214_s29] sm:$0xff] }
  0xd4   : > { %v226_v28 = vadd.f32 %v225_v22, %v224_v12 }
  0xd5   : > { %344 = vrot.lane.b32.xlu0 %v329_v31, %s1038_s15  ;;  %348 = vrot.lane.b32.xlu1 %v333_v32, %s1038_s15 }
  0xd9   : > { %350 = vrot.lane.b32.xlu1 %v335_v34, %s1038_s15  ;;  %342 = vrot.lane.b32.xlu0 %v334_v33, %s1038_s15  ;;  %s882_s15 = scalar_lea.vmem %s881_s28, 256 }
  0xda   : > { %p884_p6 = scmp.lt.s32.totalorder %s882_s15, %s876_s27 }
  0xdc   : > { %p885_p8 = por %p884_p6, %p883_p1 }
  0xde   : > { %p886_p10 = pnand %p885_p8, %p879_p0 }
 0x13f   : > { %v339_v35 = vpop.permute.xlu0 %338  ;;  %v347_v36 = vpop.permute.xlu1 %346 }
 0x140   : > { %v354_v37 = vsel %vm352_vm1, %v339_v35, %v347_v36  ;;  %v358_v38 = vsel %vm352_vm1, %v347_v36, %v339_v35  ;;  %v267_v35 = vrot.slane %v266_v25, 2  ;;  %v239_v36 = vrot.slane %v238_v26, 1 }
 0x141   : > { %v363_v39 = vmax.f32 %v330_v17, %v354_v37  ;;  %v364_v40 = vmax.f32 %v331_v18, %v358_v38  ;;  %v254_v17 = vadd.f32 %v253_v0, %v1235_v6  ;;  %v231_v6 = vrot.slane %v230_v16, 2 }
 0x142   : > { %v245_v37 = vrot.slane %v244_v27, 1  ;;  %v227_v38 = vrot.slane %v226_v28, 1 }
 0x143   : > { %v337_v41 = vpop.permute.xlu0 %336  ;;  %379 = vrot.lane.b32.xlu1 %v364_v40, %s1039_s8  ;;  %371 = vrot.lane.b32.xlu0 %v363_v39, %s1039_s8  ;;  %v341_v42 = vpop.permute.xlu1 %340 }
 0x144   : > { %v228_v59 = vadd.f32 %v227_v38, %v226_v28 }
 0x147   : > { %v345_v43 = vpop.permute.xlu0 %344  ;;  %v349_v44 = vpop.permute.xlu1 %348 }
 0x148   : > { %v353_v45 = vsel %vm352_vm1, %v337_v41, %v345_v43  ;;  %v355_v46 = vsel %vm352_vm1, %v341_v42, %v349_v44  ;;  %v357_v49 = vsel %vm352_vm1, %v345_v43, %v337_v41  ;;  %v359_v50 = vsel %vm352_vm1, %v349_v44, %v341_v42 }
 0x149   : > { %v1281_v47 = vmax.f32 %v328_v23, %v353_v45  ;;  %v1283_v48 = vmax.f32 %v332_v24, %v355_v46  ;;  %v1291_v53 = vmax.f32 %v329_v31, %v357_v49  ;;  %v1293_v54 = vmax.f32 %v333_v32, %v359_v50 }
 0x14a   : > { %v255_v23 = vrot.slane %v254_v17, 2  ;;  %v260_v24 = vadd.f32 %v259_v1, %v1239_v7  ;;  %v232_v32 = vadd.f32 %v231_v6, %v230_v16  ;;  %v268_v45 = vadd.f32 %v267_v35, %v266_v25 }
 0x14b   : > { %v343_v51 = vpop.permute.xlu0 %342  ;;  %369 = vrot.lane.b32.xlu0 %v1281_v47, %s1039_s8  ;;  %373 = vrot.lane.b32.xlu1 %v1283_v48, %s1039_s8  ;;  %v351_v52 = vpop.permute.xlu1 %350  ;;  %v240_v50 = vadd.f32 %v239_v36, %v238_v26 }
 0x14c   : > { %v356_v55 = vsel %vm352_vm1, %v343_v51, %v351_v52  ;;  %v360_v56 = vsel %vm352_vm1, %v351_v52, %v343_v51  ;;  %v233_v42 = vrot.slane %v232_v32, 1  ;;  %v246_v51 = vadd.f32 %v245_v37, %v244_v27 }
 0x14d   : > { %v1301_v57 = vmax.f32 %v334_v33, %v356_v55  ;;  %v1303_v58 = vmax.f32 %v335_v34, %v360_v56  ;;  %v256_v33 = vadd.f32 %v255_v23, %v254_v17  ;;  %v261_v34 = vrot.slane %v260_v24, 2 }
 0x14e   : > { %v234_v61 = vadd.f32 %v233_v42, %v232_v32  ;;  %v280_v9 = vcombine.low %v240_v50, %v246_v51  ;;  %v269_v11 = vrot.slane %v268_v45, 1 }
 0x14f   : > { %377 = vrot.lane.b32.xlu0 %v1291_v53, %s1039_s8  ;;  %381 = vrot.lane.b32.xlu1 %v1293_v54, %s1039_s8  ;;  %v257_v7 = vrot.slane %v256_v33, 1  ;;  %v262_v44 = vadd.f32 %v261_v34, %v260_v24 }
 0x150   : > { %v279_v16 = vcombine.low %v228_v59, %v234_v61 }
 0x151   : > { %v263_v62 = vrot.slane %v262_v44, 1 }
 0x153   : > { %383 = vrot.lane.b32.xlu1 %v1303_v58, %s1039_s8  ;;  %375 = vrot.lane.b32.xlu0 %v1301_v57, %s1039_s8  ;;  %v264_v17 = vadd.f32 %v263_v62, %v262_v44 }
 0x1b5   : > { %v372_v14 = vpop.permute.xlu0 %371  ;;  %v380_v15 = vpop.permute.xlu1 %379 }
 0x1b6   : > { %v387_v18 = vsel %vm385_vm2, %v372_v14, %v380_v15  ;;  %v391_v19 = vsel %vm385_vm2, %v380_v15, %v372_v14  ;;  %v283_v15 = vrot.slane %v280_v9, 7 }
 0x1b7   : > { %v1326_v20 = vmax.f32 %v363_v39, %v387_v18  ;;  %v1328_v2 = vmax.f32 %v364_v40, %v391_v19  ;;  %v251_v39 = vrot.slane %v250_v29, 1  ;;  %v270_v18 = vadd.f32 %v269_v11, %v268_v45 }
 0x1b8   : > { %v285_v1 = vsel %vm284_vm3, %v283_v15, %v279_v16 }
 0x1b9   : > { %412 = vrot.lane.b32.xlu1 %v1328_v2, %s1040_s23  ;;  %404 = vrot.lane.b32.xlu0 %v1326_v20, %s1040_s23  ;;  %v252_v60 = vadd.f32 %v251_v39, %v250_v29 }
 0x1bd   : > { %v370_v30 = vpop.permute.xlu0 %369  ;;  %v374_v31 = vpop.permute.xlu1 %373 }
 0x1c1   : > { %v378_v40 = vpop.permute.xlu0 %377  ;;  %v382_v41 = vpop.permute.xlu1 %381 }
 0x1c2   : > { %v386_v8 = vsel %vm385_vm2, %v370_v30, %v378_v40  ;;  %v388_v43 = vsel %vm385_vm2, %v374_v31, %v382_v41  ;;  %v390_v52 = vsel %vm385_vm2, %v378_v40, %v370_v30  ;;  %v392_v55 = vsel %vm385_vm2, %v382_v41, %v374_v31 }
 0x1c3   : > { %v1341_v46 = vmax.f32 %v1281_v47, %v386_v8  ;;  %v1344_v49 = vmax.f32 %v1283_v48, %v388_v43  ;;  %v258_v48 = vadd.f32 %v257_v7, %v256_v33  ;;  %v1355_v63 = vmax.f32 %v1291_v53, %v390_v52 }
 0x1c4   : > { %v1358_v0 = vmax.f32 %v1293_v54, %v392_v55 }
 0x1c5   : > { %v376_v56 = vpop.permute.xlu0 %375  ;;  %402 = vrot.lane.b32.xlu0 %v1341_v46, %s1040_s23  ;;  %406 = vrot.lane.b32.xlu1 %v1344_v49, %s1040_s23  ;;  %v384_v47 = vpop.permute.xlu1 %383  ;;  %v281_v14 = vcombine.low %v252_v60, %v258_v48 }
 0x1c6   : > { %v389_v12 = vsel %vm385_vm2, %v376_v56, %v384_v47  ;;  %v393_v13 = vsel %vm385_vm2, %v384_v47, %v376_v56 }
 0x1c7   : > { %v1369_v53 = vmax.f32 %v1301_v57, %v389_v12  ;;  %v1372_v54 = vmax.f32 %v1303_v58, %v393_v13  ;;  %v288_v19 = vrot.slane %v281_v14, 6  ;;  %v282_v57 = vcombine.low %v264_v17, %v270_v18 }
 0x1c8   : > { %v287_v58 = vsel %vm286_vm4, %v283_v15, %v285_v1 }
 0x1c9   : > { %410 = vrot.lane.b32.xlu0 %v1355_v63, %s1040_s23  ;;  %414 = vrot.lane.b32.xlu1 %v1358_v0, %s1040_s23  ;;  %v290_v3 = vsel %vm289_vm5, %v288_v19, %v287_v58  ;;  %v293_v4 = vrot.slane %v282_v57, 5 }
 0x1ca   : > { %v292_v22 = vsel %vm291_vm7, %v288_v19, %v290_v3 }
 0x1cb   : > { %v295_v5 = vsel %vm294_vm6, %v293_v4, %v292_v22 }
 0x1cc   : > { %v297_v6 = vsel %vm296_vm8, %v293_v4, %v295_v5 }
 0x1cd   : > { %416 = vrot.lane.b32.xlu1 %v1372_v54, %s1040_s23  ;;  %408 = vrot.lane.b32.xlu0 %v1369_v53, %s1040_s23  ;;  %v299_v23 = vadd.f32 %v297_v6, %v222_v21 }
 0x1cf   : > { %300 = vst [vmem:[%s1214_s29] sm:$0xff] %v299_v23 }
 0x1d0   : > { %889 = shalt.err (!%p886_p10)
}
 0x1d1   : > { %s890_s29 = scalar_lea.hbm %s1392_s30, 128  ;;  %s894_s20 = scalar_lea.hbm %s1548_s1, 256 }
 0x1d2   : > { %p891_p11 = scmp.ne.s32.totalorder %s1392_s30, %s890_s29  ;;  %p895_p3 = scmp.lt.u32.totalorder %s1392_s30, %s1548_s1 }
 0x1d3   : > { %p896_p9 = scmp.lt.u32.totalorder %s894_s20, %s890_s29  ;;  %p898_p7 = scmp.lt.u32.totalorder %s890_s29, %s1392_s30 }
 0x1d4   : > { %p892_p13 = pnand %p891_p11, %p1561_p2 }
 0x1d5   : > { %p897_p12 = por %p896_p9, %p895_p3 }
 0x1d6   : > { %p893_p5 = pneg %p892_p13 }
 0x1d7   : > { %p899_p4 = por %p898_p7, %p897_p12 }
 0x1d9   : > { %p900_p0 = pnand %p899_p4, %p893_p5 }
 0x1db   : > { %903 = shalt.err (!%p900_p0)
}
 0x1dc   : > { %733 = dma.vmem_to_hbm [thread:$0]  (%p1561_p2), %s1394_s26, 128, %s1392_s30, %s544_s7   ;;  %v435_v24 = vadd.s32 128, %v1245_v10  ;;  %v440_v25 = vand.u32 15, %v1245_v10  ;;  %vm418_vm9 = vcmp.lt.s32.totalorder %v1245_v10, 120 }
 0x1dd   : > { %s581_s26 = sshll.u32 %s1216_s24, 4  ;;  %s1483_s27 = scalar_lea.hbm %s1549_s2, %s729_s12  ;;  %s1485_s26 = int_to_ptr.vmem [resolvable:$true] %s581_s26 }
 0x1de   : > { %v447_v26 = vand.u32 15, %v435_v24  ;;  %vm1422_vm10 = vcmp.eq.s32.totalorder %v440_v25, 0  ;;  %s549_s28 = scalar_lea.sflag [#allocation7], %s1211_s21  ;;  %s904_s15 = scalar_lea.vmem %s1485_s26, 128 }
 0x1df   : > { %p905_p1 = scmp.ne.s32.totalorder %s1485_s26, %s904_s15  ;;  %s1042_s29 = smov [#allocation6]  }
 0x1e0   : > { %vm1426_vm11 = vcmp.eq.s32.totalorder %v447_v26, 0  ;;  %s908_s8 = sshll.u32 %s1042_s29, 4  ;;  %s909_s8 = int_to_ptr.vmem [resolvable:$false] %s908_s8 }
 0x1e1   : > { %p906_p6 = pnand %p905_p1, %p1561_p2  ;;  %s910_s16 = scalar_lea.vmem %s909_s8, 256 }
 0x1e2   : > { %p911_p10 = scmp.lt.s32.totalorder %s1485_s26, %s909_s8  ;;  %p912_p11 = scmp.lt.s32.totalorder %s910_s16, %s904_s15 }
 0x1e3   : > { %p907_p8 = pneg %p906_p6 }
 0x1e4   : > { %p913_p13 = por %p912_p11, %p911_p10 }
 0x1e6   : > { %p914_p5 = pnand %p913_p13, %p907_p8 }
 0x22b   : > { %v405_v27 = vpop.permute.xlu0 %404  ;;  %v413_v28 = vpop.permute.xlu1 %412 }
 0x22c   : > { %v420_v31 = vsel %vm418_vm9, %v405_v27, %v413_v28  ;;  %v424_v32 = vsel %vm418_vm9, %v413_v28, %v405_v27 }
 0x22d   : > { %v429_v33 = vmax.f32 %v1326_v20, %v420_v31  ;;  %v430_v34 = vmax.f32 %v1328_v2, %v424_v32 }
 0x22f   : > { %v464_v35 = vsel %vm1422_vm10, %v429_v33, 0.0  ;;  %v465_v36 = vsel %vm1426_vm11, %v430_v34, 0.0 }
 0x230   : > { %v483_v37 = vrot.slane %v464_v35, 4  ;;  %v489_v38 = vrot.slane %v465_v36, 4 }
 0x232   : > { %v484_v39 = vadd.f32 %v483_v37, %v464_v35  ;;  %v490_v40 = vadd.f32 %v489_v38, %v465_v36 }
 0x234   : > { %v485_v41 = vrot.slane %v484_v39, 2  ;;  %v491_v42 = vrot.slane %v490_v40, 2 }
 0x236   : > { %v486_v43 = vadd.f32 %v485_v41, %v484_v39  ;;  %v492_v44 = vadd.f32 %v491_v42, %v490_v40 }
 0x237   : > { %v403_v7 = vpop.permute.xlu0 %402  ;;  %v407_v8 = vpop.permute.xlu1 %406 }
 0x238   : > { %v487_v59 = vrot.slane %v486_v43, 1  ;;  %v493_v48 = vrot.slane %v492_v44, 1 }
 0x23a   : > { %v488_v57 = vadd.f32 %v487_v59, %v486_v43  ;;  %v494_v1 = vadd.f32 %v493_v48, %v492_v44 }
 0x23b   : > { %v411_v45 = vpop.permute.xlu0 %410  ;;  %v415_v20 = vpop.permute.xlu1 %414 }
 0x23c   : > { %v419_v2 = vsel %vm418_vm9, %v403_v7, %v411_v45  ;;  %v423_v50 = vsel %vm418_vm9, %v411_v45, %v403_v7  ;;  %v421_v51 = vsel %vm418_vm9, %v407_v8, %v415_v20  ;;  %v425_v56 = vsel %vm418_vm9, %v415_v20, %v407_v8 }
 0x23d   : > { %v427_v52 = vmax.f32 %v1341_v46, %v419_v2  ;;  %v428_v55 = vmax.f32 %v1355_v63, %v423_v50  ;;  %v431_v47 = vmax.f32 %v1344_v49, %v421_v51  ;;  %v432_v60 = vmax.f32 %v1358_v0, %v425_v56 }
 0x23e   : > { %v528_v27 = vcombine.low %v488_v57, %v494_v1 }
 0x23f   : > { %v462_v61 = vsel %vm1422_vm10, %v427_v52, 0.0  ;;  %v463_v62 = vsel %vm1426_vm11, %v428_v55, 0.0  ;;  %v466_v46 = vsel %vm1422_vm10, %v431_v47, 0.0  ;;  %v409_v9 = vpop.permute.xlu0 %408  ;;  %v417_v63 = vpop.permute.xlu1 %416  ;;  %v467_v49 = vsel %vm1426_vm11, %v432_v60, 0.0  ;;  %v470_v47 = vld [vmem:[%s1216_s24] sm:$0xff] }
 0x240   : > { %v471_v11 = vrot.slane %v462_v61, 4  ;;  %v477_v12 = vrot.slane %v463_v62, 4  ;;  %v495_v13 = vrot.slane %v466_v46, 4  ;;  %v501_v14 = vrot.slane %v467_v49, 4 }
 0x241   : > { %v422_v0 = vsel %vm418_vm9, %v409_v9, %v417_v63  ;;  %v426_v15 = vsel %vm418_vm9, %v417_v63, %v409_v9  ;;  %v531_v41 = vrot.slane %v528_v27, 7 }
 0x242   : > { %v472_v16 = vadd.f32 %v471_v11, %v462_v61  ;;  %v478_v17 = vadd.f32 %v477_v12, %v463_v62  ;;  %v496_v18 = vadd.f32 %v495_v13, %v466_v46  ;;  %v433_v19 = vmax.f32 %v1369_v53, %v422_v0 }
 0x243   : > { %v502_v58 = vadd.f32 %v501_v14, %v467_v49  ;;  %v434_v3 = vmax.f32 %v1372_v54, %v426_v15 }
 0x244   : > { %v473_v4 = vrot.slane %v472_v16, 2  ;;  %v479_v21 = vrot.slane %v478_v17, 2  ;;  %v497_v22 = vrot.slane %v496_v18, 2  ;;  %v468_v5 = vsel %vm1422_vm10, %v433_v19, 0.0 }
 0x245   : > { %v503_v6 = vrot.slane %v502_v58, 2  ;;  %v469_v10 = vsel %vm1426_vm11, %v434_v3, 0.0  ;;  %v507_v23 = vrot.slane %v468_v5, 4 }
 0x246   : > { %v474_v24 = vadd.f32 %v473_v4, %v472_v16  ;;  %v480_v25 = vadd.f32 %v479_v21, %v478_v17  ;;  %v498_v26 = vadd.f32 %v497_v22, %v496_v18  ;;  %v513_v53 = vrot.slane %v469_v10, 4 }
 0x247   : > { %v504_v28 = vadd.f32 %v503_v6, %v502_v58  ;;  %v508_v31 = vadd.f32 %v507_v23, %v468_v5 }
 0x248   : > { %v475_v32 = vrot.slane %v474_v24, 1  ;;  %v481_v54 = vrot.slane %v480_v25, 1  ;;  %v499_v33 = vrot.slane %v498_v26, 1  ;;  %v514_v34 = vadd.f32 %v513_v53, %v469_v10 }
 0x249   : > { %v505_v35 = vrot.slane %v504_v28, 1  ;;  %v509_v36 = vrot.slane %v508_v31, 2 }
 0x24a   : > { %v476_v29 = vadd.f32 %v475_v32, %v474_v24  ;;  %v482_v37 = vadd.f32 %v481_v54, %v480_v25  ;;  %v500_v38 = vadd.f32 %v499_v33, %v498_v26  ;;  %v515_v39 = vrot.slane %v514_v34, 2 }
 0x24b   : > { %v506_v30 = vadd.f32 %v505_v35, %v504_v28  ;;  %v510_v40 = vadd.f32 %v509_v36, %v508_v31 }
 0x24c   : > { %v527_v42 = vcombine.low %v476_v29, %v482_v37  ;;  %v516_v7 = vadd.f32 %v515_v39, %v514_v34 }
 0x24d   : > { %v529_v8 = vcombine.low %v500_v38, %v506_v30  ;;  %v511_v43 = vrot.slane %v510_v40, 1 }
 0x24e   : > { %v532_v44 = vsel %vm284_vm3, %v531_v41, %v527_v42  ;;  %v517_v45 = vrot.slane %v516_v7, 1 }
 0x24f   : > { %v534_v20 = vrot.slane %v529_v8, 6  ;;  %v512_v2 = vadd.f32 %v511_v43, %v510_v40  ;;  %v533_v50 = vsel %vm286_vm4, %v531_v41, %v532_v44 }
 0x250   : > { %v518_v51 = vadd.f32 %v517_v45, %v516_v7 }
 0x251   : > { %v535_v55 = vsel %vm289_vm5, %v534_v20, %v533_v50 }
 0x252   : > { %v530_v52 = vcombine.low %v512_v2, %v518_v51  ;;  %v536_v59 = vsel %vm291_vm7, %v534_v20, %v535_v55 }
 0x254   : > { %v537_v56 = vrot.slane %v530_v52, 5 }
 0x256   : > { %v538_v60 = vsel %vm294_vm6, %v537_v56, %v536_v59 }
 0x257   : > { %v539_v48 = vsel %vm296_vm8, %v537_v56, %v538_v60 }
 0x258   : > { %v541_v61 = vadd.f32 %v539_v48, %v470_v47 }
 0x25a   : > { %542 = vst [vmem:[%s1216_s24] sm:$0xff] %v541_v61 }
 0x25b   : > { %917 = shalt.err (!%p914_p5)
}
 0x25c   : > { %s918_s21 = scalar_lea.hbm %s1483_s27, 128  ;;  %s922_s23 = scalar_lea.hbm %s1549_s2, 256 }
 0x25d   : > { %p919_p3 = scmp.ne.s32.totalorder %s1483_s27, %s918_s21  ;;  %p923_p7 = scmp.lt.u32.totalorder %s1483_s27, %s1549_s2 }
 0x25e   : > { %p924_p4 = scmp.lt.u32.totalorder %s922_s23, %s918_s21  ;;  %p926_p1 = scmp.lt.u32.totalorder %s918_s21, %s1483_s27 }
 0x25f   : > { %p920_p9 = pnand %p919_p3, %p1561_p2 }
 0x260   : > { %p925_p0 = por %p924_p4, %p923_p7 }
 0x261   : > { %p921_p12 = pneg %p920_p9 }
 0x262   : > { %p927_p6 = por %p926_p1, %p925_p0 }
 0x264   : > { %p928_p8 = pnand %p927_p6, %p921_p12 }
 0x266   : > { %931 = shalt.err (!%p928_p8)
}
 0x267   : > { %734 = dma.vmem_to_hbm [thread:$0]  (%p1561_p2), %s1485_s26, 128, %s1483_s27, %s549_s28  }
 0x268 PF: > { %p749_p10 = scmp.ge.s32.totalorder %s1030_s19, 2  ;;  %s593_s22 = sand.u32 1, %s990_s9  }
 0x269   : > { %p1566_p11 = scmp.ne.s32.totalorder %s1558_s6, 0  ;;  %s594_s30 = scalar_lea.sflag [#allocation4], %s593_s22 }
 0x26b   : > { %p742_p13 = pnand %p749_p10, %p1566_p11 }
 0x26d   : > { %981 = dma.done.wait (!%p742_p13), %s594_s30, 128  }
 0x26e   : > { %983 = vsyncadd (!%p742_p13), %s594_s30, 4294967168  ;;  %s603_s7 = scalar_lea.sflag [#allocation7], %s593_s22 }
 0x26f   : > { %985 = dma.done.wait (!%p742_p13), %s603_s7, 128  }
 0x270   : > { %987 = vsyncadd (!%p742_p13), %s603_s7, 4294967168  ;;  %s22_s19 = sadd.s32 1, %s1030_s19   ;;  %s1567_s3 = sld [smem:[#allocation11_spill]] }
 0x271   : > { %p19_p5 = scmp.ge.s32.totalorder %s22_s19, 6   ;;  %s1568_s6 = sld [smem:[#allocation12_spill]] }
 0x272   : > { %s1569_s9 = smov %s994_s10  ;;  %s1570_s10 = smov %s998_s11 }
 0x273   : > { %s1571_s11 = smov %s1145_s4  ;;  %s1572_s12 = smov %s1006_s13 }
 0x274   : > { %s1573_s13 = smov %s1010_s14  ;;  %s1574_s14 = smov %s1148_s5 }
 0x275   : > { %s1575_s15 = smov %s1022_s17  ;;  %s1576_s16 = smov %s1026_s18 }
 0x276   : > { %s1577_s17 = smov %s1567_s3  ;;  %21 = sbr.rel (!%p19_p5) target bundleno = 11 (0xb), region = 90 }
 0x277   : > { %s1578_s18 = smov %s1568_s6 }
 0x27d   :  { %608 = vsyncpa [#allocation3], 1 }
 0x27e   :  { %610 = vsyncpa [#allocation3 + $0x1], 1 }
 0x27f   :  { %611 = vsyncpa [#allocation4], 1 }
 0x280   :  { %613 = vsyncpa [#allocation4 + $0x1], 1 }
 0x281   :  { %614 = vsyncpa [#allocation7], 1 }
 0x282   :  { %616 = vsyncpa [#allocation7 + $0x1], 1 }

</bundles_post_ra>
